<compile_context>
chip_gen: v5e
topology: v5e:2x2
jax: 0.10.0
libtpu: 0.0.40
codegen_flags: <defaults>
</compile_context>

<pallas_src>
import functools

import jax
import jax.numpy as jnp
from jax.experimental import pallas as pl
from jax.experimental.pallas import tpu as pltpu


_VMEM_LIMIT = 48 * 1024 * 1024  # above 16/32 MiB defaults, below v7x's 64 MiB


def _pick_tile(dim, preferred, multiple):
    """Pick a tile size that evenly divides `dim` (full dim is always legal)."""
    if dim <= preferred:
        return dim
    if dim % preferred == 0:
        return preferred
    t = preferred - (preferred % multiple) if preferred % multiple else preferred
    while t >= multiple:
        if dim % t == 0:
            return t
        t -= multiple
    return dim


# ----------------------------------------------------------------------------
# Kernel 1: tiled dense layer   y = x @ W + b   (W stored [in, out], bf16)
# ----------------------------------------------------------------------------
def _linear_kernel(x_ref, w_ref, b_ref, o_ref, acc_ref):
    k = pl.program_id(2)

    @pl.when(k == 0)
    def _init():
        acc_ref[...] = jnp.zeros_like(acc_ref)

    acc_ref[...] += jnp.dot(
        x_ref[...].astype(jnp.bfloat16),
        w_ref[...],
        preferred_element_type=jnp.float32,
    )

    @pl.when(k == pl.num_programs(2) - 1)
    def _finalize():
        o_ref[...] = acc_ref[...] + b_ref[...]


def linear(x2d, w_bf16, b_f32):
    """x2d: [M, Kin] f32, w_bf16: [Kin, Kout] bf16, b_f32: [Kout] -> [M, Kout] f32."""
    M, K = x2d.shape
    N = w_bf16.shape[1]
    tm = _pick_tile(M, 256, 8)
    tn = _pick_tile(N, 512, 128)
    tk = _pick_tile(K, 512, 128)
    grid = (M // tm, N // tn, K // tk)
    return pl.pallas_call(
        _linear_kernel,
        out_shape=jax.ShapeDtypeStruct((M, N), jnp.float32),
        grid=grid,
        in_specs=[
            pl.BlockSpec((tm, tk), lambda i, j, k: (i, k)),
            pl.BlockSpec((tk, tn), lambda i, j, k: (k, j)),
            pl.BlockSpec((1, tn), lambda i, j, k: (0, j)),
        ],
        out_specs=pl.BlockSpec((tm, tn), lambda i, j, k: (i, j)),
        scratch_shapes=[pltpu.VMEM((tm, tn), jnp.float32)],
        compiler_params=pltpu.CompilerParams(
            dimension_semantics=("parallel", "parallel", "arbitrary"),
            vmem_limit_bytes=_VMEM_LIMIT,
        ),
    )(x2d, w_bf16, b_f32.reshape(1, N))


# ----------------------------------------------------------------------------
# Kernel 2: fused-heads attention + fc_o, one grid step per (batch, Sq-tile)
# ----------------------------------------------------------------------------
def _attention_kernel(*refs, n_heads, head_dim, inv_scale, has_mask):
    if has_mask:
        q_ref, k_ref, v_ref, m_ref, wo_ref, bo_ref, x_ref, attn_ref = refs
        m = m_ref[0, 0]                       # (tq, Sk) int8
    else:
        q_ref, k_ref, v_ref, wo_ref, bo_ref, x_ref, attn_ref = refs

    q = q_ref[0] * inv_scale                  # (tq, HID) f32, scale folded into Q
    k = k_ref[0]                              # (Sk, HID) f32
    v = v_ref[0]                              # (Sk, HID) f32

    ctx_heads = []
    for h in range(n_heads):                  # static unroll over heads
        sl = slice(h * head_dim, (h + 1) * head_dim)
        qh = q[:, sl].astype(jnp.bfloat16)    # (tq, Dh)
        kh = k[:, sl].astype(jnp.bfloat16)    # (Sk, Dh)
        vh = v[:, sl].astype(jnp.bfloat16)    # (Sk, Dh)

        # QK^T: contract over Dh directly (no explicit transpose of K).
        energy = jax.lax.dot_general(
            qh, kh,
            dimension_numbers=(((1,), (1,)), ((), ())),
            preferred_element_type=jnp.float32,
        )                                     # (tq, Sk) f32

        if has_mask:
            energy = jnp.where(m == 0, jnp.float32(-1e10), energy)

        # Numerically stable softmax over the key axis (all in f32).
        e_max = jnp.max(energy, axis=-1, keepdims=True)
        e = jnp.exp(energy - e_max)
        attn = e * pl.reciprocal(jnp.sum(e, axis=-1, keepdims=True), approx=True)

        attn_ref[0, h] = attn
        ctx_heads.append(
            jnp.dot(attn.astype(jnp.bfloat16), vh, preferred_element_type=jnp.float32)
        )

    # Merge heads into one lane-dense [tq, HID] slab and apply fc_o in-kernel
    # (context never leaves VMEM).
    ctx = jnp.concatenate(ctx_heads, axis=-1)
    x = jnp.dot(ctx.astype(jnp.bfloat16), wo_ref[...],
                preferred_element_type=jnp.float32)
    x_ref[0] = x + bo_ref[...]


def mha_attention_out(q, k, v, mask_i8, wo_bf16, bo_f32, n_heads, head_dim, scale):
    """q: [B,Sq,HID], k/v: [B,Sk,HID], mask_i8: [B,1,Sq,Sk] int8 or None.

    Returns (fc_o(merge_heads(attn @ V)), attention)."""
    B, Sq, HID = q.shape
    Sk = k.shape[1]
    tq = _pick_tile(Sq, 256, 8)
    grid = (B, Sq // tq)
    has_mask = mask_i8 is not None

    kernel = functools.partial(
        _attention_kernel,
        n_heads=n_heads,
        head_dim=head_dim,
        inv_scale=1.0 / scale,
        has_mask=has_mask,
    )

    in_specs = [
        pl.BlockSpec((1, tq, HID), lambda b, i: (b, i, 0)),
        pl.BlockSpec((1, Sk, HID), lambda b, i: (b, 0, 0)),
        pl.BlockSpec((1, Sk, HID), lambda b, i: (b, 0, 0)),
    ]
    args = [q, k, v]
    if has_mask:
        in_specs.append(pl.BlockSpec((1, 1, tq, Sk), lambda b, i: (b, 0, i, 0)))
        args.append(mask_i8)
    # fc_o parameters: constant block index across the grid (DMA'd once, reused).
    in_specs += [
        pl.BlockSpec((HID, HID), lambda b, i: (0, 0)),
        pl.BlockSpec((1, HID), lambda b, i: (0, 0)),
    ]
    args += [wo_bf16, bo_f32.reshape(1, HID)]

    x, attn = pl.pallas_call(
        kernel,
        out_shape=(
            jax.ShapeDtypeStruct((B, Sq, HID), jnp.float32),
            jax.ShapeDtypeStruct((B, n_heads, Sq, Sk), jnp.float32),
        ),
        grid=grid,
        in_specs=in_specs,
        out_specs=(
            pl.BlockSpec((1, tq, HID), lambda b, i: (b, i, 0)),
            pl.BlockSpec((1, n_heads, tq, Sk), lambda b, i: (b, 0, i, 0)),
        ),
        compiler_params=pltpu.CompilerParams(
            dimension_semantics=("parallel", "parallel"),
            vmem_limit_bytes=_VMEM_LIMIT,
        ),
    )(*args)
    return x, attn


# ----------------------------------------------------------------------------
# Module wrapper (parameters + plumbing in plain JAX, no transposes)
# ----------------------------------------------------------------------------
class MultiHeadAttentionLayerPallas:
    def __init__(self, hid_dim, n_heads, dropout, key):
        assert hid_dim % n_heads == 0
        self.hid_dim = hid_dim
        self.n_heads = n_heads
        self.head_dim = hid_dim // n_heads
        self.scale = float(self.head_dim)  # matches torch.FloatTensor([head_dim])
        del dropout  # identity in eval mode

        keys = jax.random.split(key, 8)
        std = 1.0 / jnp.sqrt(hid_dim)

        def mk_w(k):
            return (jax.random.normal(k, (hid_dim, hid_dim), jnp.float32) * std
                    ).astype(jnp.bfloat16)     # MXU operands kept bf16

        def mk_b(k):
            return jax.random.normal(k, (hid_dim,), jnp.float32) * std

        self.wq, self.bq = mk_w(keys[0]), mk_b(keys[1])
        self.wk, self.bk = mk_w(keys[2]), mk_b(keys[3])
        self.wv, self.bv = mk_w(keys[4]), mk_b(keys[5])
        self.wo, self.bo = mk_w(keys[6]), mk_b(keys[7])

        # Fused projection weights for the self-attention / shared-KV fast paths.
        self.w_qkv = jnp.concatenate([self.wq, self.wk, self.wv], axis=1)
        self.b_qkv = jnp.concatenate([self.bq, self.bk, self.bv], axis=0)
        self.w_kv = jnp.concatenate([self.wk, self.wv], axis=1)
        self.b_kv = jnp.concatenate([self.bk, self.bv], axis=0)

    def __call__(self, query, key, value, mask=None):
        B, Sq, _ = query.shape
        Sk = key.shape[1]
        hid = self.hid_dim

        if (query is key) and (key is value):
            # Self-attention: one fused [hid, 3*hid] projection (activation read once).
            qkv = linear(query.reshape(B * Sq, hid), self.w_qkv, self.b_qkv)
            q2 = qkv[:, :hid]
            k2 = qkv[:, hid:2 * hid]
            v2 = qkv[:, 2 * hid:]
        elif key is value:
            # Cross-attention with shared K/V source: fuse the K/V projections.
            q2 = linear(query.reshape(B * Sq, hid), self.wq, self.bq)
            kv = linear(key.reshape(B * Sk, hid), self.w_kv, self.b_kv)
            k2 = kv[:, :hid]
            v2 = kv[:, hid:]
        else:
            q2 = linear(query.reshape(B * Sq, hid), self.wq, self.bq)
            k2 = linear(key.reshape(B * Sk, hid), self.wk, self.bk)
            v2 = linear(value.reshape(B * Sk, hid), self.wv, self.bv)

        q3 = q2.reshape(B, Sq, hid)
        k3 = k2.reshape(B, Sk, hid)
        v3 = v2.reshape(B, Sk, hid)

        mask_i8 = None
        if mask is not None:
            # Same semantics as torch's (mask == 0) comparison, but 4x less DMA.
            mask_i8 = jnp.broadcast_to(mask != 0, (B, 1, Sq, Sk)).astype(jnp.int8)

        # Attention + fc_o fused in one kernel; context never hits HBM.
        x, attention = mha_attention_out(
            q3, k3, v3, mask_i8, self.wo, self.bo,
            self.n_heads, self.head_dim, self.scale,
        )
        return x, attention


# ----------------------------------------------------------------------------
# Pure-JAX reference (f32) for sanity checking
# ----------------------------------------------------------------------------
def _reference(mod, query, key, value, mask=None):
    B, Sq, _ = query.shape
    Sk = key.shape[1]
    H, Dh = mod.n_heads, mod.head_dim
    f32 = jnp.float32
    q = query @ mod.wq.astype(f32) + mod.bq
    k = key @ mod.wk.astype(f32) + mod.bk
    v = value @ mod.wv.astype(f32) + mod.bv
    qh = q.reshape(B, Sq, H, Dh).transpose(0, 2, 1, 3)
    kh = k.reshape(B, Sk, H, Dh).transpose(0, 2, 1, 3)
    vh = v.reshape(B, Sk, H, Dh).transpose(0, 2, 1, 3)
    energy = jnp.einsum("bhqd,bhkd->bhqk", qh, kh) / mod.scale
    if mask is not None:
        energy = jnp.where(mask == 0, -1e10, energy)
    attn = jax.nn.softmax(energy, axis=-1)
    ctx = jnp.einsum("bhqk,bhkd->bhqd", attn, vh)
    x = ctx.transpose(0, 2, 1, 3).reshape(B, Sq, mod.hid_dim)
    x = x @ mod.wo.astype(f32) + mod.bo
    return x, attn


if __name__ == "__main__":
    B, S, HID, HEADS = 2, 8, 32, 4
    root = jax.random.PRNGKey(0)
    k_params, k_x, k_q, k_k, k_v = jax.random.split(root, 5)

    mod = MultiHeadAttentionLayerPallas(HID, HEADS, dropout=0.1, key=k_params)

    # --- Case 1: self-attention (fused QKV projection), no mask ----------------
    x_in = jax.random.normal(k_x, (B, S, HID), jnp.float32)
    out1, attn1 = mod(x_in, x_in, x_in, mask=None)
    out1 = jax.block_until_ready(out1)
    attn1 = jax.block_until_ready(attn1)
    ref1, refa1 = _reference(mod, x_in, x_in, x_in, None)

    assert out1.shape == (B, S, HID)
    assert attn1.shape == (B, HEADS, S, S)
    assert bool(jnp.all(jnp.isfinite(out1))) and bool(jnp.all(jnp.isfinite(attn1)))
    assert bool(jnp.allclose(out1, ref1, atol=5e-2, rtol=5e-2))
    assert bool(jnp.allclose(attn1, refa1, atol=5e-2, rtol=5e-2))

    # --- Case 2: cross-attention with a causal mask (masked kernel variant) ----
    q_in = jax.random.normal(k_q, (B, S, HID), jnp.float32)
    k_in = jax.random.normal(k_k, (B, S, HID), jnp.float32)
    v_in = jax.random.normal(k_v, (B, S, HID), jnp.float32)
    mask = jnp.tril(jnp.ones((S, S), jnp.float32)).reshape(1, 1, S, S)

    out2, attn2 = mod(q_in, k_in, v_in, mask=mask)
    out2 = jax.block_until_ready(out2)
    attn2 = jax.block_until_ready(attn2)
    ref2, refa2 = _reference(mod, q_in, k_in, v_in, mask)

    assert out2.shape == (B, S, HID)
    assert attn2.shape == (B, HEADS, S, S)
    assert bool(jnp.all(jnp.isfinite(out2))) and bool(jnp.all(jnp.isfinite(attn2)))
    assert bool(jnp.allclose(out2, ref2, atol=5e-2, rtol=5e-2))
    assert bool(jnp.allclose(attn2, refa2, atol=5e-2, rtol=5e-2))

    print("KERNEL_OK")
</pallas_src>

<mosaic_0001>
module attributes {stable_mosaic.version = 11 : i64} {
  func.func @_linear_kernel(%arg0: i32, %arg1: i32, %arg2: i32, %arg3: memref<16x32xf32, #tpu.memory_space<vmem>>, %arg4: memref<32x96xbf16, #tpu.memory_space<vmem>>, %arg5: memref<1x96xf32, #tpu.memory_space<vmem>>, %arg6: memref<16x96xf32, #tpu.memory_space<vmem>>, %arg7: memref<16x96xf32, #tpu.memory_space<vmem>>) attributes {dimension_semantics = [#tpu.dimension_semantics<parallel>, #tpu.dimension_semantics<parallel>, #tpu.dimension_semantics<arbitrary>], iteration_bounds = array<i64: 1, 1, 1>, scalar_prefetch = 0 : i64, scratch_operands = 1 : i64, tpu.core_type = #tpu.core_type<tc>, window_params = [{transform_indices = @transform_0, window_bounds = array<i64: 16, 32>}, {transform_indices = @transform_1, window_bounds = array<i64: 32, 96>}, {transform_indices = @transform_2, window_bounds = array<i64: 1, 96>}, {transform_indices = @transform_3, window_bounds = array<i64: 16, 96>}]} {
    %c0_i32 = arith.constant 0 : i32
    %0 = arith.cmpi eq, %arg2, %c0_i32 : i32
    %1 = arith.extui %0 : i1 to i32
    %c0_i32_0 = arith.constant 0 : i32
    %2 = arith.cmpi ne, %1, %c0_i32_0 : i32
    scf.if %2 {
      %cst_10 = arith.constant 0.000000e+00 : f32
      %13 = vector.broadcast %cst_10 : f32 to vector<16x96xf32>
      %c0_11 = arith.constant 0 : index
      %c0_12 = arith.constant 0 : index
      %14 = vector.load %arg7[%c0_11, %c0_12] : memref<16x96xf32, #tpu.memory_space<vmem>>, vector<16x96xf32>
      tpu.vector_store %arg7[%c0_11, %c0_12], %13 {strides = array<i32>} : memref<16x96xf32, #tpu.memory_space<vmem>>, vector<16x96xf32>,
    } else {
    }
    %c0 = arith.constant 0 : index
    %c0_1 = arith.constant 0 : index
    %3 = vector.load %arg7[%c0, %c0_1] : memref<16x96xf32, #tpu.memory_space<vmem>>, vector<16x96xf32>
    %c0_2 = arith.constant 0 : index
    %c0_3 = arith.constant 0 : index
    %4 = vector.load %arg3[%c0_2, %c0_3] : memref<16x32xf32, #tpu.memory_space<vmem>>, vector<16x32xf32>
    %5 = arith.truncf %4 : vector<16x32xf32> to vector<16x32xbf16>
    %c0_4 = arith.constant 0 : index
    %c0_5 = arith.constant 0 : index
    %6 = vector.load %arg4[%c0_4, %c0_5] : memref<32x96xbf16, #tpu.memory_space<vmem>>, vector<32x96xbf16>
    %cst = arith.constant dense<0.000000e+00> : vector<16x96xf32>
    %7 = tpu.matmul %5, %6, %cst {dimension_numbers = #tpu.dot_dimension_numbers<[1], [0], [0], [1], [0, 0, 1, 1], [], []>} : vector<16x32xbf16>, vector<32x96xbf16>, vector<16x96xf32> -> vector<16x96xf32>
    %8 = arith.addf %3, %7 : vector<16x96xf32>
    %c0_6 = arith.constant 0 : index
    %c0_7 = arith.constant 0 : index
    %9 = vector.load %arg7[%c0_6, %c0_7] : memref<16x96xf32, #tpu.memory_space<vmem>>, vector<16x96xf32>
    tpu.vector_store %arg7[%c0_6, %c0_7], %8 {strides = array<i32>} : memref<16x96xf32, #tpu.memory_space<vmem>>, vector<16x96xf32>,
    %c0_i32_8 = arith.constant 0 : i32
    %10 = arith.cmpi eq, %arg2, %c0_i32_8 : i32
    %11 = arith.extui %10 : i1 to i32
    %c0_i32_9 = arith.constant 0 : i32
    %12 = arith.cmpi ne, %11, %c0_i32_9 : i32
    scf.if %12 {
      %c0_10 = arith.constant 0 : index
      %c0_11 = arith.constant 0 : index
      %13 = vector.load %arg7[%c0_10, %c0_11] : memref<16x96xf32, #tpu.memory_space<vmem>>, vector<16x96xf32>
      %c0_12 = arith.constant 0 : index
      %c0_13 = arith.constant 0 : index
      %14 = vector.load %arg5[%c0_12, %c0_13] : memref<1x96xf32, #tpu.memory_space<vmem>>, vector<1x96xf32>
      %15 = vector.broadcast %14 : vector<1x96xf32> to vector<16x96xf32>
      %16 = arith.addf %13, %15 : vector<16x96xf32>
      %c0_14 = arith.constant 0 : index
      %c0_15 = arith.constant 0 : index
      %17 = vector.load %arg6[%c0_14, %c0_15] : memref<16x96xf32, #tpu.memory_space<vmem>>, vector<16x96xf32>
      tpu.vector_store %arg6[%c0_14, %c0_15], %16 {strides = array<i32>} : memref<16x96xf32, #tpu.memory_space<vmem>>, vector<16x96xf32>,
    } else {
    }
    return
  }
  func.func @transform_0(%arg0: i32, %arg1: i32, %arg2: i32) -> (i32, i32) {
    %c0_i32 = arith.constant 0 : i32
    return %arg0, %arg2 : i32, i32
  }
  func.func @transform_1(%arg0: i32, %arg1: i32, %arg2: i32) -> (i32, i32) {
    %c0_i32 = arith.constant 0 : i32
    return %arg2, %arg1 : i32, i32
  }
  func.func @transform_2(%arg0: i32, %arg1: i32, %arg2: i32) -> (i32, i32) {
    %c0_i32 = arith.constant 0 : i32
    %c0_i32_0 = arith.constant 0 : i32
    return %c0_i32, %arg1 : i32, i32
  }
  func.func @transform_3(%arg0: i32, %arg1: i32, %arg2: i32) -> (i32, i32) {
    %c0_i32 = arith.constant 0 : i32
    return %arg0, %arg1 : i32, i32
  }
}

</mosaic_0001>

<bundles_post_ra>
// kernel: tpu_custom_call.1
= control target key start
LH: loop header
LB: loop body
LE: loop exit
PB: predicated region body
PF: predicated region fallthrough
CT: control target
= control target key end

     0   :  { %8 = vsyncpa [#allocation4], 0  ;;  %s282_s0 = inlined_call_operand.hbm [shape: f32[16,32], index: 0, kind: input, shape index: {}]   ;;  %s283_s1 = inlined_call_operand.hbm [shape: bf16[32,96], index: 1, kind: input, shape index: {}]   ;;  %s284_s2 = inlined_call_operand.vmem [shape: f32[1,96], index: 2, kind: input, shape index: {}]   ;;  %s285_s3 = inlined_call_operand.hbm [shape: f32[16,96], index: 3, kind: output, shape index: {}]  }
   0x1   :  { %9 = vsyncpa [#allocation7], 0 }
   0x2   :  { %10 = vsyncpa [#allocation5], 0  ;;  %s15_s14 = sshll.u32 %s282_s0, 4  ;;  %s230_s15 = smov [#allocation3]   ;;  %s16_s14 = int_to_ptr.hbm [resolvable:$true] %s15_s14 }
   0x3   :  { %s17_s16 = sshll.u32 %s230_s15, 4  ;;  %s28_s19 = sshll.u32 %s283_s1, 4  ;;  %s18_s16 = int_to_ptr.vmem [resolvable:$true] %s17_s16  ;;  %s29_s19 = int_to_ptr.hbm [resolvable:$true] %s28_s19 }
   0x4   :  { %s231_s20 = smov 128   ;;  %s232_s21 = smov 8  }
   0x5   :  { %23 = dma.hbm_to_vmem [thread:$0]  %s16_s14, 256, %s18_s16, [#allocation4], %s231_s20, %s231_s20, %s232_s21  }
   0x6   :  { %s233_s22 = smov [#allocation6]   ;;  %s234_s24 = smov 64  }
   0x7   :  { %s30_s23 = sshll.u32 %s233_s22, 4  ;;  %s235_s0 = smov 4   ;;  %s31_s23 = int_to_ptr.vmem [resolvable:$true] %s30_s23 }
   0x8   :  { %36 = dma.hbm_to_vmem [thread:$0]  %s29_s19, 256, %s31_s23, [#allocation7], %s234_s24, %s234_s24, %s235_s0  }
   0x9   :  { %224 = dma.done.wait [#allocation4], 256  }
   0xa   :  { %225 = vsyncadd [#allocation4], 4294967040 }
   0xb   :  { %226 = dma.done.wait [#allocation7], 256  }
   0xc   :  { %227 = vsyncadd [#allocation7], 4294967040  ;;  %vm52_vm0 = vcmask 785408   ;;  %v236_v0 = vmov 0.0   ;;  %v142_v1 = vld [vmem:[#allocation6 + $0x8] sm:$0xff]  ;;  %v141_v2 = vld [vmem:[#allocation6] sm:$0xff] }
   0xd   :  { %53 = vst.msk [vmem:[#allocation2] sm:$0xff] %vm52_vm0, %v236_v0  ;;  %86 = vmatpush.bf16.msra.mxu0 %v142_v1  ;;  %v57_v3 = vld [vmem:[#allocation3] sm:$0xff]  ;;  %v58_v4 = vld [vmem:[#allocation3 + $0x8] sm:$0xff]  ;;  %vm76_vm1 = vcmask 261120   ;;  %v151_v10 = vld [vmem:[%s284_s2] ss:$0 sm:$0xff] }
   0xe   :  { %54 = vst.msk [vmem:[#allocation2 + $0x8] sm:$0xff] %vm52_vm0, %v236_v0  ;;  %v59_v5 = vpack.c.bf16 %v58_v4, %v57_v3  ;;  %s237_s26 = smov [#allocation8]   ;;  %s118_s30 = sshll.u32 %s285_s3, 4  ;;  %s119_s30 = int_to_ptr.hbm [resolvable:$true] %s118_s30 }
   0xf   :  { %s116_s27 = sshll.u32 %s237_s26, 4  ;;  %s117_s27 = int_to_ptr.vmem [resolvable:$true] %s116_s27 }
  0x11   :  { %87 = vmatpush.bf16.msra.mxu0 %v141_v2 }
  0x14   :  { %140 = vmatmul.msk.bf16.vlgmr.msra.gmra.mxu0 %vm76_vm1, %v59_v5  ;;  %v55_v6 = vld [vmem:[#allocation2] sm:$0xff] }
  0x15   :  { %v56_v9 = vld [vmem:[#allocation2 + $0x8] sm:$0xff] }
  0x91   :  { %v89_v7 = vpop.f32.mrf.mxu0 }
  0x92   :  { %v94_v8 = vadd.f32 %v89_v7, %v55_v6 }
  0x94   :  { %97 = vst.msk [vmem:[#allocation2] sm:$0xff] %vm52_vm0, %v94_v8 }
  0x99   :  { %v91_v11 = vpop.f32.mrf.mxu0 }
  0x9a   :  { %v95_v12 = vadd.f32 %v91_v11, %v56_v9 }
  0x9b   :  { %v102_v13 = vld [vmem:[#allocation2] sm:$0xff] }
  0x9c   :  { %98 = vst.msk [vmem:[#allocation2 + $0x8] sm:$0xff] %vm52_vm0, %v95_v12  ;;  %v108_v14 = vadd.f32 %v151_v10, %v102_v13 }
  0x9e   :  { %110 = vst.msk [vmem:[#allocation8] sm:$0xff] %vm52_vm0, %v108_v14 }
  0xa3   :  { %v103_v15 = vld [vmem:[#allocation2 + $0x8] sm:$0xff] }
  0xa4   :  { %v109_v16 = vadd.f32 %v151_v10, %v103_v15 }
  0xa6   :  { %111 = vst.msk [vmem:[#allocation8 + $0x8] sm:$0xff] %vm52_vm0, %v109_v16 }
  0xa7   :  { %124 = dma.vmem_to_hbm [thread:$0]  %s117_s27, 256, %s119_s30, [#allocation5], %s231_s20, %s231_s20, %s232_s21  }
  0xa8   :  { %228 = dma.done.wait [#allocation5], 256  }
  0xa9   :  { %229 = vsyncadd [#allocation5], 4294967040 }
  0xaa   :  { %129 = vsyncpa [#allocation4], 1 }
  0xab   :  { %130 = vsyncpa [#allocation7], 1 }
  0xac   :  { %131 = vsyncpa [#allocation5], 1 }

</bundles_post_ra>
